<compile_context>
chip_gen: v6e
topology: v6e:2x2x1
jax: 0.10.0
libtpu: 0.0.40
codegen_flags: <defaults>
</compile_context>

<pallas_src>
import functools

import jax
import jax.numpy as jnp
from jax import lax
from jax.experimental import pallas as pl
from jax.experimental.pallas import tpu as pltpu

_LANE = 128


def _softbce_kernel(pred_ref, tgt_ref, out_ref, *,
                    smooth_factor, ignore_index, n_elem, block_rows,
                    needs_tail_mask):
    i = pl.program_id(0)

    x = pred_ref[...].astype(jnp.float32)
    t = tgt_ref[...].astype(jnp.float32)

    # Label smoothing (applied to the BCE target only; the ignore mask uses
    # the raw y_true, matching the PyTorch module).
    if smooth_factor is not None:
        soft_t = (1.0 - t) * smooth_factor + t * (1.0 - smooth_factor)
    else:
        soft_t = t

    # Numerically-stable binary_cross_entropy_with_logits (no weight /
    # pos_weight):  loss = max(x, 0) - x*t + log(1 + exp(-|x|))
    # exp / log go to the EUP (separate bundle slot); everything else is VPU.
    loss = jnp.maximum(x, 0.0) - x * soft_t + jnp.log1p(jnp.exp(-jnp.abs(x)))

    mask = None
    if ignore_index is not None:
        mask = t != jnp.float32(ignore_index)
    if needs_tail_mask:
        # Global element index of every slot in this block (int32 is fine for
        # inputs below 2^31 elements).
        row = lax.broadcasted_iota(jnp.int32, x.shape, 0) + i * block_rows
        lane = lax.broadcasted_iota(jnp.int32, x.shape, 1)
        valid = (row * _LANE + lane) < n_elem
        mask = valid if mask is None else jnp.logical_and(mask, valid)
    if mask is not None:
        # jnp.where (select) instead of multiply: garbage in the unspecified
        # tail of a partial block can never leak NaN/Inf into the sum.
        loss = jnp.where(mask, loss, 0.0)

    # Per-block, lane-dense partial sum (1, 1, 128).  No carried state, so the
    # grid axis can be "parallel" (v7x dual TensorCore) with disjoint writes.
    out_ref[...] = jnp.sum(loss, axis=0, keepdims=True)[None]


def soft_bce_with_logits_loss(y_pred, y_true, *,
                              weight=None, pos_weight=None,
                              smooth_factor=None,
                              ignore_index=-100,
                              reduction="mean",
                              block_rows=2048):
    """y_pred: (N, 1, H, W) logits; y_true: (N, H, W) or (N, 1, H, W)."""
    # TODO(synk): `weight` / `pos_weight` buffers default to None in the module
    # and are not implemented here.
    if weight is not None or pos_weight is not None:
        raise NotImplementedError("weight / pos_weight not supported")

    # Mirror torch's .squeeze(1): only drop the channel dim when it is size 1.
    if y_pred.ndim >= 2 and y_pred.shape[1] == 1:
        y_pred = jnp.squeeze(y_pred, axis=1)        # (N, H, W)
    if y_true.ndim == y_pred.ndim + 1 and y_true.shape[1] == 1:
        y_true = jnp.squeeze(y_true, axis=1)
    # TODO(synk): the C>1 broadcasting case (y_pred (N,C,H,W) vs y_true
    # (N,H,W)) is not handled; typical segmentation usage has C == 1.
    assert y_pred.shape == y_true.shape

    n_elem = y_pred.size

    # Flatten and view lane-dense.  No wrapper-side dtype up-cast: the kernel
    # casts per tile, so bf16 inputs move half the HBM bytes.
    pred_flat = jnp.ravel(y_pred)
    tgt_flat = jnp.ravel(y_true)

    pad = (-n_elem) % _LANE
    if pad:
        # Only a <128-element pad, and only when n_elem % 128 != 0.
        pred_flat = jnp.pad(pred_flat, (0, pad))
        tgt_flat = jnp.pad(tgt_flat, (0, pad))
    rows = (n_elem + pad) // _LANE

    # Tile choice: biggest multiple-of-8 row block up to `block_rows`.
    # 2 inputs x 2 pipeline buffers x (2048, 128) f32 = 4 MiB total, well under
    # the scoped-VMEM defaults on v5e / v6e / v7x.
    if rows <= block_rows:
        bh = rows          # full-array sublane extent is always a legal block
    else:
        bh = max(8, (block_rows // 8) * 8)
    num_blocks = pl.cdiv(rows, bh)

    pred2d = pred_flat.reshape(rows, _LANE)
    tgt2d = tgt_flat.reshape(rows, _LANE)

    # Tail masking only needed if there is lane padding or a partial last block.
    needs_tail_mask = bool(pad) or (rows % bh != 0)

    kernel = functools.partial(
        _softbce_kernel,
        smooth_factor=smooth_factor,
        ignore_index=ignore_index,
        n_elem=n_elem,
        block_rows=bh,
        needs_tail_mask=needs_tail_mask)

    partials = pl.pallas_call(
        kernel,
        out_shape=jax.ShapeDtypeStruct((num_blocks, 1, _LANE), jnp.float32),
        grid_spec=pltpu.PrefetchScalarGridSpec(
            num_scalar_prefetch=0,
            grid=(num_blocks,),
            in_specs=[
                pl.BlockSpec((bh, _LANE), lambda i: (i, 0)),
                pl.BlockSpec((bh, _LANE), lambda i: (i, 0)),
            ],
            out_specs=pl.BlockSpec((1, 1, _LANE), lambda i: (i, 0, 0)),
        ),
        compiler_params=pltpu.CompilerParams(
            dimension_semantics=("parallel",)),
    )(pred2d, tgt2d)

    loss_sum = jnp.sum(partials)

    # NOTE: 'mean' divides by the total element count including ignored pixels,
    # matching segmentation_models_pytorch's SoftBCEWithLogitsLoss semantics.
    if reduction == "mean":
        return loss_sum / n_elem
    if reduction == "sum":
        return loss_sum
    # TODO(synk): reduction='none' would require returning the unreduced
    # per-element loss, which this partial-sum kernel does not emit.
    raise ValueError("only 'mean' and 'sum' reductions supported here")


def _reference(y_pred, y_true, smooth_factor, ignore_index, reduction):
    y_pred = jnp.squeeze(y_pred, axis=1).astype(jnp.float32)
    t = y_true.astype(jnp.float32)
    soft_t = (1 - t) * smooth_factor + t * (1 - smooth_factor) \
        if smooth_factor is not None else t
    loss = jnp.maximum(y_pred, 0) - y_pred * soft_t + \
        jnp.log1p(jnp.exp(-jnp.abs(y_pred)))
    if ignore_index is not None:
        loss = loss * (t != float(ignore_index)).astype(jnp.float32)
    return loss.mean() if reduction == "mean" else loss.sum()


def _make_inputs(key, N, H, W, ignore_frac=0.1, dtype=jnp.float32):
    k1, k2, k3 = jax.random.split(key, 3)
    y_pred = jax.random.normal(k1, (N, 1, H, W), dtype=jnp.float32).astype(dtype)
    y_true = jax.random.bernoulli(k2, 0.5, (N, H, W)).astype(dtype)
    ignore_mask = jax.random.bernoulli(k3, ignore_frac, (N, H, W))
    y_true = jnp.where(ignore_mask, jnp.asarray(-100.0, dtype), y_true)
    return y_pred, y_true


if __name__ == "__main__":
    key = jax.random.PRNGKey(0)
    ka, kb = jax.random.split(key, 2)

    smooth_factor = 0.1
    ignore_index = -100

    # Case 1: canonical small shape (n_elem multiple of 128, single block).
    y_pred, y_true = _make_inputs(ka, N=2, H=16, W=16)
    loss = soft_bce_with_logits_loss(
        y_pred, y_true,
        smooth_factor=smooth_factor,
        ignore_index=ignore_index,
        reduction="mean")
    loss = jax.block_until_ready(loss)
    ref = _reference(y_pred, y_true, smooth_factor, ignore_index, "mean")
    assert jnp.allclose(loss, ref, rtol=1e-5, atol=1e-6), (loss, ref)

    # Case 2: exercises lane padding, multi-block grid and partial last block
    # (n_elem = 2*36*36 = 2592 -> 21 rows of 128 with a 96-element pad;
    #  block_rows=8 -> 3 grid steps, last one partial), plus 'sum' reduction.
    y_pred2, y_true2 = _make_inputs(kb, N=2, H=36, W=36)
    loss2 = soft_bce_with_logits_loss(
        y_pred2, y_true2,
        smooth_factor=smooth_factor,
        ignore_index=ignore_index,
        reduction="sum",
        block_rows=8)
    loss2 = jax.block_until_ready(loss2)
    ref2 = _reference(y_pred2, y_true2, smooth_factor, ignore_index, "sum")
    assert jnp.allclose(loss2, ref2, rtol=1e-5, atol=1e-4), (loss2, ref2)

    # Case 3: bf16 inputs (kernel casts per tile; wrapper moves half the bytes),
    # no label smoothing.
    y_pred3, y_true3 = _make_inputs(ka, N=2, H=16, W=16, dtype=jnp.bfloat16)
    loss3 = soft_bce_with_logits_loss(
        y_pred3, y_true3,
        smooth_factor=None,
        ignore_index=ignore_index,
        reduction="mean")
    loss3 = jax.block_until_ready(loss3)
    ref3 = _reference(y_pred3, y_true3, None, ignore_index, "mean")
    assert jnp.allclose(loss3, ref3, rtol=2e-2, atol=1e-3), (loss3, ref3)

    print("KERNEL_OK")
</pallas_src>

<mosaic_0001>
module attributes {stable_mosaic.version = 11 : i64} {
  func.func @_softbce_kernel(%arg0: i32, %arg1: memref<4x128xf32, #tpu.memory_space<vmem>>, %arg2: memref<4x128xf32, #tpu.memory_space<vmem>>, %arg3: memref<1x1x128xf32, #tpu.memory_space<vmem>>) attributes {dimension_semantics = [#tpu.dimension_semantics<parallel>], iteration_bounds = array<i64: 1>, scalar_prefetch = 0 : i64, scratch_operands = 0 : i64, tpu.core_type = #tpu.core_type<tc>, window_params = [{transform_indices = @transform_0, window_bounds = array<i64: 4, 128>}, {transform_indices = @transform_1, window_bounds = array<i64: 4, 128>}, {transform_indices = @transform_2, window_bounds = array<i64: 1, 1, 128>}]} {
    %c0 = arith.constant 0 : index
    %c0_0 = arith.constant 0 : index
    %0 = vector.load %arg1[%c0, %c0_0] : memref<4x128xf32, #tpu.memory_space<vmem>>, vector<4x128xf32>
    %c0_1 = arith.constant 0 : index
    %c0_2 = arith.constant 0 : index
    %1 = vector.load %arg2[%c0_1, %c0_2] : memref<4x128xf32, #tpu.memory_space<vmem>>, vector<4x128xf32>
    %cst = arith.constant 1.000000e+00 : f32
    %2 = vector.broadcast %cst : f32 to vector<4x128xf32>
    %3 = arith.subf %2, %1 : vector<4x128xf32>
    %cst_3 = arith.constant 1.000000e-01 : f32
    %4 = vector.broadcast %cst_3 : f32 to vector<4x128xf32>
    %5 = arith.mulf %3, %4 : vector<4x128xf32>
    %cst_4 = arith.constant 0.899999976 : f32
    %6 = vector.broadcast %cst_4 : f32 to vector<4x128xf32>
    %7 = arith.mulf %1, %6 : vector<4x128xf32>
    %8 = arith.addf %5, %7 : vector<4x128xf32>
    %cst_5 = arith.constant 0.000000e+00 : f32
    %9 = vector.broadcast %cst_5 : f32 to vector<4x128xf32>
    %10 = arith.maximumf %0, %9 : vector<4x128xf32>
    %11 = arith.mulf %0, %8 : vector<4x128xf32>
    %12 = arith.subf %10, %11 : vector<4x128xf32>
    %13 = math.absf %0 : vector<4x128xf32>
    %cst_6 = arith.constant 0.000000e+00 : f32
    %14 = vector.broadcast %cst_6 : f32 to vector<4x128xf32>
    %15 = arith.subf %14, %13 : vector<4x128xf32>
    %16 = math.exp %15 : vector<4x128xf32>
    %17 = math.log1p %16 : vector<4x128xf32>
    %18 = arith.addf %12, %17 : vector<4x128xf32>
    %cst_7 = arith.constant -1.000000e+02 : f32
    %19 = vector.broadcast %cst_7 : f32 to vector<4x128xf32>
    %20 = arith.cmpf one, %1, %19 : vector<4x128xf32>
    %cst_8 = arith.constant 0.000000e+00 : f32
    %21 = vector.broadcast %cst_8 : f32 to vector<4x128xf32>
    %22 = arith.select %20, %18, %21 : vector<4x128xi1>, vector<4x128xf32>
    %cst_9 = arith.constant dense<0.000000e+00> : vector<128xf32>
    %23 = vector.multi_reduction <add>, %22, %cst_9 [0] : vector<4x128xf32> to vector<128xf32>
    %24 = vector.shape_cast %23 : vector<128xf32> to vector<1x128xf32>
    %25 = vector.shape_cast %24 : vector<1x128xf32> to vector<1x1x128xf32>
    %c0_10 = arith.constant 0 : index
    %c0_11 = arith.constant 0 : index
    %c0_12 = arith.constant 0 : index
    %26 = vector.load %arg3[%c0_10, %c0_11, %c0_12] : memref<1x1x128xf32, #tpu.memory_space<vmem>>, vector<1x1x128xf32>
    tpu.vector_store %arg3[%c0_10, %c0_11, %c0_12], %25 {strides = array<i32>} : memref<1x1x128xf32, #tpu.memory_space<vmem>>, vector<1x1x128xf32>,
    return
  }
  func.func @transform_0(%arg0: i32) -> (i32, i32) {
    %c0_i32 = arith.constant 0 : i32
    %c0_i32_0 = arith.constant 0 : i32
    return %arg0, %c0_i32 : i32, i32
  }
  func.func @transform_1(%arg0: i32) -> (i32, i32) {
    %c0_i32 = arith.constant 0 : i32
    %c0_i32_0 = arith.constant 0 : i32
    return %arg0, %c0_i32 : i32, i32
  }
  func.func @transform_2(%arg0: i32) -> (i32, i32, i32) {
    %c0_i32 = arith.constant 0 : i32
    %c0_i32_0 = arith.constant 0 : i32
    %c0_i32_1 = arith.constant 0 : i32
    return %arg0, %c0_i32, %c0_i32_0 : i32, i32, i32
  }
}

</mosaic_0001>

<bundles_post_ra>
// kernel: tpu_custom_call.1
= control target key start
LH: loop header
LB: loop body
LE: loop exit
PB: predicated region body
PF: predicated region fallthrough
CT: control target
= control target key end

     0   :  { %7 = vsyncpa [#allocation3], 0  ;;  %s186_s0 = inlined_call_operand.hbm [shape: f32[4,128], index: 0, kind: input, shape index: {}]   ;;  %s187_s1 = inlined_call_operand.hbm [shape: f32[4,128], index: 1, kind: input, shape index: {}]   ;;  %s188_s2 = inlined_call_operand.hbm [shape: f32[1,1,128], index: 2, kind: output, shape index: {}]  }
   0x1   :  { %8 = vsyncpa [#allocation6], 0 }
   0x2   :  { %9 = vsyncpa [#allocation4], 0  ;;  %s159_s9 = smov [#allocation2]   ;;  %s160_s11 = smov [#allocation5]  }
   0x3   :  { %s16_s10 = sshll.u32 %s159_s9, 4  ;;  %s26_s12 = sshll.u32 %s160_s11, 4  ;;  %s17_s10 = int_to_ptr.vmem [resolvable:$true] %s16_s10  ;;  %s27_s12 = int_to_ptr.vmem [resolvable:$true] %s26_s12 }
   0x4   :  { %s101_s13 = scalar_lea.vmem %s17_s10, 64  ;;  %p106_p1 = scmp.lt.s32.totalorder %s17_s10, %s17_s10 }
   0x5   :  { %p102_p0 = scmp.ne.s32.totalorder %s17_s10, %s101_s13  ;;  %p107_p2 = scmp.lt.s32.totalorder %s101_s13, %s101_s13 }
   0x7   :  { %p108_p3 = por %p107_p2, %p106_p1 }
   0x9   :  { %p109_p4 = pnand %p108_p3, %p102_p0 }
   0xb   :  { %112 = shalt.err (!%p109_p4)
}
   0xc   :  { %19 = dma.hbm_to_vmem [thread:$0]  %s186_s0, 64, %s17_s10, [#allocation3]  }
   0xd   :  { %s121_s16 = scalar_lea.vmem %s27_s12, 64  ;;  %p126_p6 = scmp.lt.s32.totalorder %s27_s12, %s27_s12 }
   0xe   :  { %p122_p5 = scmp.ne.s32.totalorder %s27_s12, %s121_s16  ;;  %p127_p7 = scmp.lt.s32.totalorder %s121_s16, %s121_s16 }
  0x10   :  { %p128_p8 = por %p127_p7, %p126_p6 }
  0x12   :  { %p129_p9 = pnand %p128_p8, %p122_p5 }
  0x14   :  { %132 = shalt.err (!%p129_p9)
}
  0x15   :  { %29 = dma.hbm_to_vmem [thread:$0]  %s187_s1, 64, %s27_s12, [#allocation6]  }
  0x16   :  { %153 = dma.done.wait [#allocation3], 64  }
  0x17   :  { %154 = vsyncadd [#allocation3], 4294967232 }
  0x18   :  { %155 = dma.done.wait [#allocation6], 64  }
  0x19   :  { %156 = vsyncadd [#allocation6], 4294967232  ;;  %v36_v0 = vld [vmem:[#allocation2] sm:$0xf]  ;;  %v37_v4 = vld [vmem:[#allocation5] sm:$0xf] }
  0x1a   :  { %v45_v1 = vand.u32 2147483647, %v36_v0  ;;  %v38_v6 = vsub.f32 1.0, %v37_v4  ;;  %v40_v9 = vmul.f32 0.9, %v37_v4  ;;  %v42_v13 = vmax.f32 %v36_v0, 0.0 }
  0x1b   :  { %vm59_vm1 = vcmp.ne.f32.partialorder %v37_v4, -100.0  ;;  %vm61_vm2 = vcmask 1043456   ;;  %s161_s0 = smov [#allocation7]  }
  0x1c   :  { %v46_v2 = vsub.f32 0.0, %v45_v1  ;;  %v39_v8 = vmul.f32 0.1, %v38_v6  ;;  %s76_s1 = sshll.u32 %s161_s0, 4  ;;  %s77_s1 = int_to_ptr.vmem [resolvable:$true] %s76_s1 }
  0x1d   :  { %s133_s19 = scalar_lea.vmem %s77_s1, 16  ;;  %s137_s20 = scalar_lea.vmem %s77_s1, 32 }
  0x1e   :  { %v47_v3 = vmul.f32 1.442695, %v46_v2  ;;  %v41_v11 = vadd.f32 %v40_v9, %v39_v8  ;;  %p134_p10 = scmp.ne.s32.totalorder %s77_s1, %s133_s19  ;;  %p138_p11 = scmp.lt.s32.totalorder %s77_s1, %s77_s1 }
  0x1f   :  { %p139_p12 = scmp.lt.s32.totalorder %s137_s20, %s133_s19 }
  0x20   :  { %89 = vpow2.f32 %v47_v3  ;;  %v43_v14 = vmul.f32 %v41_v11, %v36_v0 }
  0x21   :  { %p140_p13 = por %p139_p12, %p138_p11 }
  0x22   :  { %v44_v18 = vsub.f32 %v42_v13, %v43_v14 }
  0x23   :  { %p141_p0 = pnand %p140_p13, %p134_p10 }
  0x2d   :  { %v90_v5 = vpop.eup %89 }
  0x2e   :  { %v49_v7 = vadd.f32 1.0, %v90_v5  ;;  %v52_v10 = vmul.f32 -0.5, %v90_v5  ;;  %v55_v15 = vand.u32 2147483647, %v90_v5 }
  0x30   :  { %91 = vlog2.f32 %v49_v7  ;;  %v53_v12 = vadd.f32 1.0, %v52_v10  ;;  %vm56_vm0 = vcmp.lt.f32.partialorder %v55_v15, 0.0004427343 }
  0x32   :  { %v54_v16 = vmul.f32 %v90_v5, %v53_v12 }
  0x3d   :  { %v92_v17 = vpop.eup %91 }
  0x3e   :  { %v51_v19 = vmul.f32 0.6931472, %v92_v17 }
  0x40   :  { %v57_v20 = vsel %vm56_vm0, %v54_v16, %v51_v19 }
  0x41   :  { %v58_v21 = vadd.f32 %v57_v20, %v44_v18 }
  0x43   :  { %v60_v22 = vsel %vm59_vm1, %v58_v21, 0.0 }
  0x44   :  { %v62_v23 = vsel %vm61_vm2, %v60_v22, 0.0 }
  0x45   :  { %v63_v24 = vrot.slane %v62_v23, 4 }
  0x47   :  { %v64_v25 = vadd.f32 %v63_v24, %v62_v23 }
  0x49   :  { %v65_v26 = vrot.slane %v64_v25, 2 }
  0x4b   :  { %v66_v27 = vadd.f32 %v65_v26, %v64_v25 }
  0x4d   :  { %v67_v28 = vrot.slane %v66_v27, 1 }
  0x4f   :  { %v68_v29 = vadd.f32 %v67_v28, %v66_v27 }
  0x51   :  { %69 = vst [vmem:[#allocation7] sm:$0x1] %v68_v29 }
  0x52   :  { %144 = shalt.err (!%p141_p0)
}
  0x53   :  { %79 = dma.vmem_to_hbm [thread:$0]  %s77_s1, 16, %s188_s2, [#allocation4]  }
  0x54   :  { %157 = dma.done.wait [#allocation4], 16  }
  0x55   :  { %158 = vsyncadd [#allocation4], 4294967280 }
  0x56   :  { %83 = vsyncpa [#allocation3], 1 }
  0x57   :  { %84 = vsyncpa [#allocation6], 1 }
  0x58   :  { %85 = vsyncpa [#allocation4], 1 }

</bundles_post_ra>
